<compile_context>
chip_gen: v6e
topology: v6e:2x2x1
jax: 0.10.0
libtpu: 0.0.40
codegen_flags: <defaults>
</compile_context>

<pallas_src>
import math
from functools import partial

import jax
import jax.numpy as jnp
from jax.experimental import pallas as pl
from jax.experimental.pallas import tpu as pltpu


_OUT_W = 8  # packed output lane width: col 0 = logp, col 1 = value, rest zero pad


def _round_up(x, m):
    return (x + m - 1) // m * m


def _actor_critic_kernel(
    state_ref, action_ref,
    w1_ref, b1_ref, w2_ref, b2_ref, w3_ref, b3_ref,
    inv_var_ref, const_ref,
    out_ref,
    *, adim,
):
    """Fused actor+critic MLP + diagonal-Gaussian log_prob for one batch tile."""
    mm_dtype = w1_ref.dtype
    x = state_ref[...]                                                   # (TB, S)

    # Fused actor|critic layer 1 and block-diagonal layers 2/3.
    h = jnp.dot(x.astype(mm_dtype), w1_ref[...],
                preferred_element_type=jnp.float32) + b1_ref[...]        # (TB, 2H)
    h = jnp.maximum(h, 0.0)
    h = jnp.dot(h.astype(mm_dtype), w2_ref[...],
                preferred_element_type=jnp.float32) + b2_ref[...]        # (TB, 2H)
    h = jnp.maximum(h, 0.0)
    y3 = jnp.dot(h.astype(mm_dtype), w3_ref[...],
                 preferred_element_type=jnp.float32) + b3_ref[...]       # (TB, P3)

    # tanh over the whole slab; the value/pad columns are excluded from the
    # quadratic form because inv_var_pad == 0 there, and the critic value is
    # taken from y3 (pre-tanh).
    mean = jnp.tanh(y3)
    diff = action_ref[...] - mean                                        # (TB, P3)
    quad = jnp.sum(diff * diff * inv_var_ref[...], axis=-1, keepdims=True)  # (TB, 1)
    logp = const_ref[...] - 0.5 * quad                                   # (TB, 1)

    col = jax.lax.broadcasted_iota(jnp.int32, (1, y3.shape[-1]), 1)
    value = jnp.sum(jnp.where(col == adim, y3, 0.0), axis=-1, keepdims=True)  # (TB, 1)

    # Pack [logp, value, 0, ...] into a single output slab (one store stream).
    ocol = jax.lax.broadcasted_iota(jnp.int32, (1, out_ref.shape[-1]), 1)
    out_ref[...] = (jnp.where(ocol == 0, logp, 0.0)
                    + jnp.where(ocol == 1, value, 0.0))


def init_params(key, state_dim, action_dim, hidden=64):
    """PyTorch-Linear-like uniform init. Weights stored (in_features, out_features)."""
    def linear(k, fan_in, fan_out):
        kw, kb = jax.random.split(k)
        bound = 1.0 / math.sqrt(fan_in)
        w = jax.random.uniform(kw, (fan_in, fan_out), jnp.float32, -bound, bound)
        b = jax.random.uniform(kb, (1, fan_out), jnp.float32, -bound, bound)
        return w, b

    keys = jax.random.split(key, 6)
    aw1, ab1 = linear(keys[0], state_dim, hidden)
    aw2, ab2 = linear(keys[1], hidden, hidden)
    aw3, ab3 = linear(keys[2], hidden, action_dim)
    cw1, cb1 = linear(keys[3], state_dim, hidden)
    cw2, cb2 = linear(keys[4], hidden, hidden)
    cw3, cb3 = linear(keys[5], hidden, 1)
    return dict(aw1=aw1, ab1=ab1, aw2=aw2, ab2=ab2, aw3=aw3, ab3=ab3,
                cw1=cw1, cb1=cb1, cw2=cw2, cb2=cb2, cw3=cw3, cb3=cb3)


def pack_params(params, action_dim, matmul_dtype=jnp.float32):
    """One-time packing of actor+critic weights into fused MXU-friendly slabs.

    matmul_dtype=jnp.bfloat16 is an optional v6e/v7x MXU optimization (f32
    accumulation is kept in-kernel); biases always stay f32."""
    aw1, ab1 = params["aw1"], params["ab1"]
    aw2, ab2 = params["aw2"], params["ab2"]
    aw3, ab3 = params["aw3"], params["ab3"]
    cw1, cb1 = params["cw1"], params["cb1"]
    cw2, cb2 = params["cw2"], params["cb2"]
    cw3, cb3 = params["cw3"], params["cb3"]
    hidden = aw2.shape[0]
    adim = action_dim
    p3 = max(8, _round_up(adim + 1, 8))                      # layer-3 packed width

    w1 = jnp.concatenate([aw1, cw1], axis=1)                 # (S, 2H)
    b1 = jnp.concatenate([ab1, cb1], axis=1)                 # (1, 2H)
    z = jnp.zeros((hidden, hidden), jnp.float32)
    w2 = jnp.concatenate(
        [jnp.concatenate([aw2, z], axis=1),
         jnp.concatenate([z, cw2], axis=1)], axis=0)         # (2H, 2H) block-diag
    b2 = jnp.concatenate([ab2, cb2], axis=1)                 # (1, 2H)
    w3 = jnp.zeros((2 * hidden, p3), jnp.float32)
    w3 = w3.at[:hidden, :adim].set(aw3).at[hidden:, adim:adim + 1].set(cw3)
    b3 = jnp.zeros((1, p3), jnp.float32)
    b3 = b3.at[:, :adim].set(ab3).at[:, adim:adim + 1].set(cb3)

    return dict(
        w1=w1.astype(matmul_dtype), b1=b1,
        w2=w2.astype(matmul_dtype), b2=b2,
        w3=w3.astype(matmul_dtype), b3=b3,
        p3=p3, action_dim=adim,
    )


def actor_critic_evaluate(state, action, packed, action_var, *, max_batch_tile=1024):
    """Pallas equivalent of ActorCritic.evaluate(state, action) (continuous branch).

    Returns (action_logprobs (B,), state_values (B, 1), dist_entropy (B,))."""
    batch, state_dim = state.shape
    adim = packed["action_dim"]
    p3 = packed["p3"]
    h2 = packed["w2"].shape[0]

    # Batch-independent distribution constants, hoisted out of the kernel.
    action_var = action_var.astype(jnp.float32)
    log_2pi = math.log(2.0 * math.pi)
    sum_log_var = jnp.sum(jnp.log(action_var))
    inv_var_pad = jnp.zeros((1, p3), jnp.float32).at[0, :adim].set(1.0 / action_var)
    logp_const = (-0.5 * adim * log_2pi - 0.5 * sum_log_var).reshape(1, 1)
    entropy = 0.5 * adim * (1.0 + log_2pi) + 0.5 * sum_log_var   # scalar; batch-independent

    # Batch tile: full batch if it fits, else a multiple-of-8 tile; pad the
    # batch so the grid divides evenly (padded rows are computed then dropped).
    tile = batch if batch <= max_batch_tile else max_batch_tile
    batch_pad = _round_up(batch, tile)
    pad_rows = batch_pad - batch
    state_p = jnp.pad(state.astype(jnp.float32), ((0, pad_rows), (0, 0)))
    action_p = jnp.pad(action.astype(jnp.float32),
                       ((0, pad_rows), (0, p3 - adim)))          # also pad to P3 lanes

    grid = (pl.cdiv(batch_pad, tile),)
    row_spec = lambda w: pl.BlockSpec((tile, w), lambda i: (i, 0))   # batch-tiled
    cst_spec = lambda r, c: pl.BlockSpec((r, c), lambda i: (0, 0))   # VMEM-resident

    out = pl.pallas_call(
        partial(_actor_critic_kernel, adim=adim),
        out_shape=jax.ShapeDtypeStruct((batch_pad, _OUT_W), jnp.float32),
        grid=grid,
        in_specs=[
            row_spec(state_dim),        # state
            row_spec(p3),               # action (lane-padded)
            cst_spec(state_dim, h2),    # packed layer-1 weight
            cst_spec(1, h2),            # packed layer-1 bias
            cst_spec(h2, h2),           # packed layer-2 weight (block-diag)
            cst_spec(1, h2),            # packed layer-2 bias
            cst_spec(h2, p3),           # packed layer-3 weight (block-diag)
            cst_spec(1, p3),            # packed layer-3 bias
            cst_spec(1, p3),            # 1/var, zero in value/pad columns
            cst_spec(1, 1),             # log-prob additive constant
        ],
        out_specs=row_spec(_OUT_W),
        compiler_params=pltpu.CompilerParams(
            dimension_semantics=("parallel",)),
    )(state_p, action_p,
      packed["w1"], packed["b1"], packed["w2"], packed["b2"],
      packed["w3"], packed["b3"], inv_var_pad, logp_const)

    logp = out[:batch, 0]
    value = out[:batch, 1:2]
    ent = jnp.broadcast_to(entropy, (batch,))
    return logp, value, ent


def reference_evaluate(state, action, params, action_var):
    """Pure-JAX reference mirroring the PyTorch module (unfused weights)."""
    h = jnp.maximum(state @ params["aw1"] + params["ab1"], 0.0)
    h = jnp.maximum(h @ params["aw2"] + params["ab2"], 0.0)
    mean = jnp.tanh(h @ params["aw3"] + params["ab3"])
    c = jnp.maximum(state @ params["cw1"] + params["cb1"], 0.0)
    c = jnp.maximum(c @ params["cw2"] + params["cb2"], 0.0)
    value = c @ params["cw3"] + params["cb3"]
    diff = action - mean
    a = action.shape[-1]
    logp = (-0.5 * jnp.sum(diff * diff / action_var, axis=-1)
            - 0.5 * a * math.log(2.0 * math.pi)
            - 0.5 * jnp.sum(jnp.log(action_var)))
    ent = jnp.full((state.shape[0],),
                   0.5 * a * (1.0 + math.log(2.0 * math.pi))
                   + 0.5 * jnp.sum(jnp.log(action_var)))
    return logp, value, ent


if __name__ == "__main__":
    # Small shapes consistent with the module: state_dim=8, action_dim=4, hidden=64.
    B, STATE_DIM, ACTION_DIM = 8, 8, 4
    ACTION_STD_INIT = 0.6

    key = jax.random.PRNGKey(0)
    kp, ks, ka = jax.random.split(key, 3)

    params = init_params(kp, STATE_DIM, ACTION_DIM)
    packed = pack_params(params, ACTION_DIM)          # f32; pass jnp.bfloat16 on v6e/v7x
    action_var = jnp.full((ACTION_DIM,), ACTION_STD_INIT * ACTION_STD_INIT,
                          dtype=jnp.float32)

    state = jax.random.normal(ks, (B, STATE_DIM), dtype=jnp.float32)
    action = jax.random.normal(ka, (B, ACTION_DIM), dtype=jnp.float32)

    logp, value, ent = actor_critic_evaluate(state, action, packed, action_var)
    jax.block_until_ready((logp, value, ent))

    ref_logp, ref_value, ref_ent = reference_evaluate(state, action, params, action_var)
    assert jnp.allclose(logp, ref_logp, atol=1e-4, rtol=1e-4)
    assert jnp.allclose(value, ref_value, atol=1e-4, rtol=1e-4)
    assert jnp.allclose(ent, ref_ent, atol=1e-4, rtol=1e-4)

    # Second check: exercise the multi-tile grid path (grid=3) with a batch that
    # does not divide the tile (wrapper pads rows, then slices them back off).
    B2 = 20
    ks2, ka2 = jax.random.split(jax.random.PRNGKey(1))
    state2 = jax.random.normal(ks2, (B2, STATE_DIM), dtype=jnp.float32)
    action2 = jax.random.normal(ka2, (B2, ACTION_DIM), dtype=jnp.float32)
    logp2, value2, ent2 = actor_critic_evaluate(state2, action2, packed, action_var,
                                                max_batch_tile=8)
    jax.block_until_ready((logp2, value2, ent2))
    r_logp2, r_value2, r_ent2 = reference_evaluate(state2, action2, params, action_var)
    assert jnp.allclose(logp2, r_logp2, atol=1e-4, rtol=1e-4)
    assert jnp.allclose(value2, r_value2, atol=1e-4, rtol=1e-4)
    assert jnp.allclose(ent2, r_ent2, atol=1e-4, rtol=1e-4)

    # TODO(synk): act() requires sampling from MultivariateNormal/Categorical;
    # random draws stay in jax.random outside the kernel (not the training hot path).
    print("KERNEL_OK")
</pallas_src>

<mosaic_0001>
module attributes {stable_mosaic.version = 11 : i64} {
  func.func @_actor_critic_kernel(%arg0: i32, %arg1: memref<8x8xf32, #tpu.memory_space<vmem>>, %arg2: memref<8x8xf32, #tpu.memory_space<vmem>>, %arg3: memref<8x128xf32, #tpu.memory_space<vmem>>, %arg4: memref<1x128xf32, #tpu.memory_space<vmem>>, %arg5: memref<128x128xf32, #tpu.memory_space<vmem>>, %arg6: memref<1x128xf32, #tpu.memory_space<vmem>>, %arg7: memref<128x8xf32, #tpu.memory_space<vmem>>, %arg8: memref<1x8xf32, #tpu.memory_space<vmem>>, %arg9: memref<1x8xf32, #tpu.memory_space<vmem>>, %arg10: memref<1x1xf32, #tpu.memory_space<vmem>>, %arg11: memref<8x8xf32, #tpu.memory_space<vmem>>) attributes {dimension_semantics = [#tpu.dimension_semantics<parallel>], iteration_bounds = array<i64: 1>, scalar_prefetch = 0 : i64, scratch_operands = 0 : i64, tpu.core_type = #tpu.core_type<tc>, window_params = [{transform_indices = @transform_0, window_bounds = array<i64: 8, 8>}, {transform_indices = @transform_1, window_bounds = array<i64: 8, 8>}, {pipeline_mode = #tpu.pipeline_mode<synchronous>, transform_indices = @transform_2, window_bounds = array<i64: 8, 128>}, {pipeline_mode = #tpu.pipeline_mode<synchronous>, transform_indices = @transform_3, window_bounds = array<i64: 1, 128>}, {pipeline_mode = #tpu.pipeline_mode<synchronous>, transform_indices = @transform_4, window_bounds = array<i64: 128, 128>}, {pipeline_mode = #tpu.pipeline_mode<synchronous>, transform_indices = @transform_5, window_bounds = array<i64: 1, 128>}, {pipeline_mode = #tpu.pipeline_mode<synchronous>, transform_indices = @transform_6, window_bounds = array<i64: 128, 8>}, {pipeline_mode = #tpu.pipeline_mode<synchronous>, transform_indices = @transform_7, window_bounds = array<i64: 1, 8>}, {pipeline_mode = #tpu.pipeline_mode<synchronous>, transform_indices = @transform_8, window_bounds = array<i64: 1, 8>}, {pipeline_mode = #tpu.pipeline_mode<synchronous>, transform_indices = @transform_9, window_bounds = array<i64: 1, 1>}, {transform_indices = @transform_10, window_bounds = array<i64: 8, 8>}]} {
    %c0 = arith.constant 0 : index
    %c0_0 = arith.constant 0 : index
    %0 = vector.load %arg1[%c0, %c0_0] : memref<8x8xf32, #tpu.memory_space<vmem>>, vector<8x8xf32>
    %c0_1 = arith.constant 0 : index
    %c0_2 = arith.constant 0 : index
    %1 = vector.load %arg3[%c0_1, %c0_2] : memref<8x128xf32, #tpu.memory_space<vmem>>, vector<8x128xf32>
    %cst = arith.constant dense<0.000000e+00> : vector<8x128xf32>
    %2 = tpu.matmul %0, %1, %cst {dimension_numbers = #tpu.dot_dimension_numbers<[1], [0], [0], [1], [0, 0, 1, 1], [], []>} : vector<8x8xf32>, vector<8x128xf32>, vector<8x128xf32> -> vector<8x128xf32>
    %c0_3 = arith.constant 0 : index
    %c0_4 = arith.constant 0 : index
    %3 = vector.load %arg4[%c0_3, %c0_4] : memref<1x128xf32, #tpu.memory_space<vmem>>, vector<1x128xf32>
    %4 = vector.broadcast %3 : vector<1x128xf32> to vector<8x128xf32>
    %5 = arith.addf %2, %4 : vector<8x128xf32>
    %cst_5 = arith.constant 0.000000e+00 : f32
    %6 = vector.broadcast %cst_5 : f32 to vector<8x128xf32>
    %7 = arith.maximumf %5, %6 : vector<8x128xf32>
    %c0_6 = arith.constant 0 : index
    %c0_7 = arith.constant 0 : index
    %8 = vector.load %arg5[%c0_6, %c0_7] : memref<128x128xf32, #tpu.memory_space<vmem>>, vector<128x128xf32>
    %cst_8 = arith.constant dense<0.000000e+00> : vector<8x128xf32>
    %9 = tpu.matmul %7, %8, %cst_8 {dimension_numbers = #tpu.dot_dimension_numbers<[1], [0], [0], [1], [0, 0, 1, 1], [], []>} : vector<8x128xf32>, vector<128x128xf32>, vector<8x128xf32> -> vector<8x128xf32>
    %c0_9 = arith.constant 0 : index
    %c0_10 = arith.constant 0 : index
    %10 = vector.load %arg6[%c0_9, %c0_10] : memref<1x128xf32, #tpu.memory_space<vmem>>, vector<1x128xf32>
    %11 = vector.broadcast %10 : vector<1x128xf32> to vector<8x128xf32>
    %12 = arith.addf %9, %11 : vector<8x128xf32>
    %cst_11 = arith.constant 0.000000e+00 : f32
    %13 = vector.broadcast %cst_11 : f32 to vector<8x128xf32>
    %14 = arith.maximumf %12, %13 : vector<8x128xf32>
    %c0_12 = arith.constant 0 : index
    %c0_13 = arith.constant 0 : index
    %15 = vector.load %arg7[%c0_12, %c0_13] : memref<128x8xf32, #tpu.memory_space<vmem>>, vector<128x8xf32>
    %cst_14 = arith.constant dense<0.000000e+00> : vector<8x8xf32>
    %16 = tpu.matmul %14, %15, %cst_14 {dimension_numbers = #tpu.dot_dimension_numbers<[1], [0], [0], [1], [0, 0, 1, 1], [], []>} : vector<8x128xf32>, vector<128x8xf32>, vector<8x8xf32> -> vector<8x8xf32>
    %c0_15 = arith.constant 0 : index
    %c0_16 = arith.constant 0 : index
    %17 = vector.load %arg8[%c0_15, %c0_16] : memref<1x8xf32, #tpu.memory_space<vmem>>, vector<1x8xf32>
    %18 = vector.broadcast %17 : vector<1x8xf32> to vector<8x8xf32>
    %19 = arith.addf %16, %18 : vector<8x8xf32>
    %20 = math.tanh %19 : vector<8x8xf32>
    %c0_17 = arith.constant 0 : index
    %c0_18 = arith.constant 0 : index
    %21 = vector.load %arg2[%c0_17, %c0_18] : memref<8x8xf32, #tpu.memory_space<vmem>>, vector<8x8xf32>
    %22 = arith.subf %21, %20 : vector<8x8xf32>
    %23 = arith.mulf %22, %22 : vector<8x8xf32>
    %c0_19 = arith.constant 0 : index
    %c0_20 = arith.constant 0 : index
    %24 = vector.load %arg9[%c0_19, %c0_20] : memref<1x8xf32, #tpu.memory_space<vmem>>, vector<1x8xf32>
    %25 = vector.broadcast %24 : vector<1x8xf32> to vector<8x8xf32>
    %26 = arith.mulf %23, %25 : vector<8x8xf32>
    %cst_21 = arith.constant dense<0.000000e+00> : vector<8xf32>
    %27 = vector.multi_reduction <add>, %26, %cst_21 [1] : vector<8x8xf32> to vector<8xf32>
    %28 = vector.shape_cast %27 : vector<8xf32> to vector<8x1xf32>
    %c0_22 = arith.constant 0 : index
    %c0_23 = arith.constant 0 : index
    %29 = vector.load %arg10[%c0_22, %c0_23] : memref<1x1xf32, #tpu.memory_space<vmem>>, vector<1x1xf32>
    %cst_24 = arith.constant 5.000000e-01 : f32
    %30 = vector.broadcast %cst_24 : f32 to vector<8x1xf32>
    %31 = arith.mulf %30, %28 : vector<8x1xf32>
    %32 = vector.broadcast %29 : vector<1x1xf32> to vector<8x1xf32>
    %33 = arith.subf %32, %31 : vector<8x1xf32>
    %34 = tpu.iota {dimensions = array<i32: 1>} : vector<1x8xi32>
    %c4_i32 = arith.constant 4 : i32
    %35 = vector.broadcast %c4_i32 : i32 to vector<1x8xi32>
    %36 = arith.cmpi eq, %34, %35 : vector<1x8xi32>
    %cst_25 = arith.constant 0.000000e+00 : f32
    %37 = vector.shape_cast %36 : vector<1x8xi1> to vector<1x8xi1>
    %38 = vector.broadcast %37 : vector<1x8xi1> to vector<8x8xi1>
    %39 = vector.broadcast %cst_25 : f32 to vector<8x8xf32>
    %40 = arith.select %38, %19, %39 : vector<8x8xi1>, vector<8x8xf32>
    %cst_26 = arith.constant dense<0.000000e+00> : vector<8xf32>
    %41 = vector.multi_reduction <add>, %40, %cst_26 [1] : vector<8x8xf32> to vector<8xf32>
    %42 = vector.shape_cast %41 : vector<8xf32> to vector<8x1xf32>
    %43 = tpu.iota {dimensions = array<i32: 1>} : vector<1x8xi32>
    %c0_i32 = arith.constant 0 : i32
    %44 = vector.broadcast %c0_i32 : i32 to vector<1x8xi32>
    %45 = arith.cmpi eq, %43, %44 : vector<1x8xi32>
    %cst_27 = arith.constant 0.000000e+00 : f32
    %46 = vector.shape_cast %45 : vector<1x8xi1> to vector<1x8xi1>
    %47 = vector.broadcast %46 : vector<1x8xi1> to vector<8x8xi1>
    %48 = vector.shape_cast %33 : vector<8x1xf32> to vector<8x1xf32>
    %49 = vector.broadcast %48 : vector<8x1xf32> to vector<8x8xf32>
    %50 = vector.broadcast %cst_27 : f32 to vector<8x8xf32>
    %51 = arith.select %47, %49, %50 : vector<8x8xi1>, vector<8x8xf32>
    %c1_i32 = arith.constant 1 : i32
    %52 = vector.broadcast %c1_i32 : i32 to vector<1x8xi32>
    %53 = arith.cmpi eq, %43, %52 : vector<1x8xi32>
    %cst_28 = arith.constant 0.000000e+00 : f32
    %54 = vector.shape_cast %53 : vector<1x8xi1> to vector<1x8xi1>
    %55 = vector.broadcast %54 : vector<1x8xi1> to vector<8x8xi1>
    %56 = vector.shape_cast %42 : vector<8x1xf32> to vector<8x1xf32>
    %57 = vector.broadcast %56 : vector<8x1xf32> to vector<8x8xf32>
    %58 = vector.broadcast %cst_28 : f32 to vector<8x8xf32>
    %59 = arith.select %55, %57, %58 : vector<8x8xi1>, vector<8x8xf32>
    %60 = arith.addf %51, %59 : vector<8x8xf32>
    %c0_29 = arith.constant 0 : index
    %c0_30 = arith.constant 0 : index
    %61 = vector.load %arg11[%c0_29, %c0_30] : memref<8x8xf32, #tpu.memory_space<vmem>>, vector<8x8xf32>
    tpu.vector_store %arg11[%c0_29, %c0_30], %60 {strides = array<i32>} : memref<8x8xf32, #tpu.memory_space<vmem>>, vector<8x8xf32>,
    return
  }
  func.func @transform_0(%arg0: i32) -> (i32, i32) {
    %c0_i32 = arith.constant 0 : i32
    %c0_i32_0 = arith.constant 0 : i32
    return %arg0, %c0_i32 : i32, i32
  }
  func.func @transform_1(%arg0: i32) -> (i32, i32) {
    %c0_i32 = arith.constant 0 : i32
    %c0_i32_0 = arith.constant 0 : i32
    return %arg0, %c0_i32 : i32, i32
  }
  func.func @transform_2(%arg0: i32) -> (i32, i32) {
    %c0_i32 = arith.constant 0 : i32
    %c0_i32_0 = arith.constant 0 : i32
    %c0_i32_1 = arith.constant 0 : i32
    return %c0_i32, %c0_i32_0 : i32, i32
  }
  func.func @transform_3(%arg0: i32) -> (i32, i32) {
    %c0_i32 = arith.constant 0 : i32
    %c0_i32_0 = arith.constant 0 : i32
    %c0_i32_1 = arith.constant 0 : i32
    return %c0_i32, %c0_i32_0 : i32, i32
  }
  func.func @transform_4(%arg0: i32) -> (i32, i32) {
    %c0_i32 = arith.constant 0 : i32
    %c0_i32_0 = arith.constant 0 : i32
    %c0_i32_1 = arith.constant 0 : i32
    return %c0_i32, %c0_i32_0 : i32, i32
  }
  func.func @transform_5(%arg0: i32) -> (i32, i32) {
    %c0_i32 = arith.constant 0 : i32
    %c0_i32_0 = arith.constant 0 : i32
    %c0_i32_1 = arith.constant 0 : i32
    return %c0_i32, %c0_i32_0 : i32, i32
  }
  func.func @transform_6(%arg0: i32) -> (i32, i32) {
    %c0_i32 = arith.constant 0 : i32
    %c0_i32_0 = arith.constant 0 : i32
    %c0_i32_1 = arith.constant 0 : i32
    return %c0_i32, %c0_i32_0 : i32, i32
  }
  func.func @transform_7(%arg0: i32) -> (i32, i32) {
    %c0_i32 = arith.constant 0 : i32
    %c0_i32_0 = arith.constant 0 : i32
    %c0_i32_1 = arith.constant 0 : i32
    return %c0_i32, %c0_i32_0 : i32, i32
  }
  func.func @transform_8(%arg0: i32) -> (i32, i32) {
    %c0_i32 = arith.constant 0 : i32
    %c0_i32_0 = arith.constant 0 : i32
    %c0_i32_1 = arith.constant 0 : i32
    return %c0_i32, %c0_i32_0 : i32, i32
  }
  func.func @transform_9(%arg0: i32) -> (i32, i32) {
    %c0_i32 = arith.constant 0 : i32
    %c0_i32_0 = arith.constant 0 : i32
    %c0_i32_1 = arith.constant 0 : i32
    return %c0_i32, %c0_i32_0 : i32, i32
  }
  func.func @transform_10(%arg0: i32) -> (i32, i32) {
    %c0_i32 = arith.constant 0 : i32
    %c0_i32_0 = arith.constant 0 : i32
    return %arg0, %c0_i32 : i32, i32
  }
}

</mosaic_0001>

<bundles_post_ra>
// kernel: tpu_custom_call.1
= control target key start
LH: loop header
LB: loop body
LE: loop exit
PB: predicated region body
PF: predicated region fallthrough
CT: control target
= control target key end

     0   :  { %s817_s0 = inlined_call_operand.vmem [shape: f32[8,8], index: 0, kind: input, shape index: {}]   ;;  %s818_s1 = inlined_call_operand.hbm [shape: f32[8,8], index: 1, kind: input, shape index: {}]   ;;  %s819_s2 = inlined_call_operand.hbm [shape: f32[8,128], index: 2, kind: input, shape index: {}]   ;;  %s820_s3 = inlined_call_operand.vmem [shape: f32[1,128], index: 3, kind: input, shape index: {}]   ;;  %s821_s4 = inlined_call_operand.vmem [shape: f32[128,128], index: 4, kind: input, shape index: {}]   ;;  %s822_s5 = inlined_call_operand.vmem [shape: f32[1,128], index: 5, kind: input, shape index: {}]   ;;  %s823_s6 = inlined_call_operand.vmem [shape: f32[128,8], index: 6, kind: input, shape index: {}]   ;;  %s824_s7 = inlined_call_operand.vmem [shape: f32[1,8], index: 7, kind: input, shape index: {}]   ;;  %s825_s8 = inlined_call_operand.vmem [shape: f32[1,8], index: 8, kind: input, shape index: {}]   ;;  %s826_s9 = inlined_call_operand.<no memory space> [shape: f32[1,1], index: 9, kind: input, shape index: {}]   ;;  %s827_s10 = inlined_call_operand.hbm [shape: f32[8,8], index: 10, kind: output, shape index: {}]  }
   0x1   :  { %v15_v0 = vstv %s826_s9 }
   0x2   :  { %16 = vst [vmem:[#allocation2] sm:$0x1] %v15_v0 }
   0x3   :  { %17 = vsyncpa [#allocation4], 0 }
   0x4   :  { %18 = vsyncpa [#allocation7], 0 }
   0x5   :  { %19 = vsyncpa [#allocation5], 0  ;;  %s590_s15 = smov [#allocation3]   ;;  %s591_s17 = smov [#allocation6]  }
   0x6   :  { %s28_s16 = sshll.u32 %s590_s15, 4  ;;  %s38_s18 = sshll.u32 %s591_s17, 4  ;;  %s29_s16 = int_to_ptr.vmem [resolvable:$true] %s28_s16  ;;  %s39_s18 = int_to_ptr.vmem [resolvable:$true] %s38_s18 }
   0x7   :  { %s532_s19 = scalar_lea.vmem %s29_s16, 128  ;;  %p537_p1 = scmp.lt.s32.totalorder %s29_s16, %s29_s16 }
   0x8   :  { %p533_p0 = scmp.ne.s32.totalorder %s29_s16, %s532_s19  ;;  %p538_p2 = scmp.lt.s32.totalorder %s532_s19, %s532_s19 }
   0xa   :  { %p539_p3 = por %p538_p2, %p537_p1 }
   0xc   :  { %p540_p4 = pnand %p539_p3, %p533_p0 }
   0xe   :  { %543 = shalt.err (!%p540_p4)
}
   0xf   :  { %31 = dma.hbm_to_vmem [thread:$0]  %s818_s1, 128, %s29_s16, [#allocation4]  }
  0x10   :  { %s552_s9 = scalar_lea.vmem %s39_s18, 128  ;;  %p557_p6 = scmp.lt.s32.totalorder %s39_s18, %s39_s18 }
  0x11   :  { %p553_p5 = scmp.ne.s32.totalorder %s39_s18, %s552_s9  ;;  %p558_p7 = scmp.lt.s32.totalorder %s552_s9, %s552_s9 }
  0x13   :  { %p559_p8 = por %p558_p7, %p557_p6 }
  0x15   :  { %p560_p9 = pnand %p559_p8, %p553_p5 }
  0x17   :  { %563 = shalt.err (!%p560_p9)
}
  0x18   :  { %41 = dma.hbm_to_vmem [thread:$0]  %s819_s2, 128, %s39_s18, [#allocation7]  }
  0x19   :  { %584 = dma.done.wait [#allocation4], 128  }
  0x1a   :  { %585 = vsyncadd [#allocation4], 4294967168 }
  0x1b   :  { %586 = dma.done.wait [#allocation7], 128  }
  0x1c   :  { %587 = vsyncadd [#allocation7], 4294967168  ;;  %v592_v1 = vmov 0.0   ;;  %vm593_vm0 = vmmov 0   ;;  %vm71_vm1 = vcmask 64512   ;;  %v63_v2 = vld [vmem:[#allocation6] sm:$0xff]  ;;  %v357_v50 = vlaneseq }
  0x1d   :  { %439 = vmatprep.subr.mxu0 %v592_v1  ;;  %441 = vmatprep.mubr.msk.f32.mxu0 %vm593_vm0, %v592_v1  ;;  %v62_v3 = vld [vmem:[%s817_s0] sm:$0xff]  ;;  %v161_v4 = vld [vmem:[%s821_s4 + $0x78] sm:$0xff]  ;;  %v160_v5 = vld [vmem:[%s821_s4 + $0x70] sm:$0xff]  ;;  %v594_v61 = vmov 0  }
  0x1e   :  { %444 = vmatprep.subr.mxu1 %v592_v1  ;;  %476 = vmatprep.mubr.msk.f32.mxu1 %vm593_vm0, %v592_v1  ;;  %v159_v6 = vld [vmem:[%s821_s4 + $0x68] sm:$0xff]  ;;  %v158_v7 = vld [vmem:[%s821_s4 + $0x60] sm:$0xff]  ;;  %v157_v8 = vld [vmem:[%s821_s4 + $0x58] sm:$0xff]  ;;  %v358_v54 = vand.u32 127, %v357_v50 }
  0x1f   :  { %440 = vmatpush3.msra.mxu0 %v63_v2  ;;  %445 = vmatpush3.msra.mxu1 %v161_v4  ;;  %v156_v9 = vld [vmem:[%s821_s4 + $0x50] sm:$0xff]  ;;  %v155_v10 = vld [vmem:[%s821_s4 + $0x48] sm:$0xff]  ;;  %v154_v11 = vld [vmem:[%s821_s4 + $0x40] sm:$0xff] }
  0x20   :  { %442 = vmatmul.mubr.msk.f32.vlgmr.msra.gmra.mxu0 %vm71_vm1, %v62_v3  ;;  %446 = vmatprep.subr.mxu1 %v592_v1  ;;  %v153_v12 = vld [vmem:[%s821_s4 + $0x38] sm:$0xff]  ;;  %v152_v13 = vld [vmem:[%s821_s4 + $0x30] sm:$0xff]  ;;  %v151_v14 = vld [vmem:[%s821_s4 + $0x28] sm:$0xff]  ;;  %vm359_vm2 = vcmp.eq.s32.totalorder %v358_v54, 4  ;;  %vm375_vm3 = vcmp.eq.s32.totalorder %v358_v54, 1  ;;  %vm366_vm4 = vcmp.eq.s32.totalorder %v358_v54, 0 }
  0x21   :  { %447 = vmatpush3.msra.mxu1 %v160_v5  ;;  %479 = vmatprep.subr.mxu0 %v592_v1  ;;  %v150_v15 = vld [vmem:[%s821_s4 + $0x20] sm:$0xff]  ;;  %v149_v16 = vld [vmem:[%s821_s4 + $0x18] sm:$0xff]  ;;  %v148_v17 = vld [vmem:[%s821_s4 + $0x10] sm:$0xff] }
  0x22   :  { %448 = vmatprep.subr.mxu1 %v592_v1  ;;  %511 = vmatprep.mubr.msk.f32.mxu0 %vm593_vm0, %v592_v1  ;;  %v147_v18 = vld [vmem:[%s821_s4 + $0x8] sm:$0xff]  ;;  %v146_v19 = vld [vmem:[%s821_s4] sm:$0xff]  ;;  %v255_v20 = vld [vmem:[%s823_s6 + $0x78] sm:$0xff] }
  0x23   :  { %449 = vmatpush3.msra.mxu1 %v159_v6  ;;  %v254_v21 = vld [vmem:[%s823_s6 + $0x70] sm:$0xff]  ;;  %480 = vmatpush3.msra.mxu0 %v255_v20  ;;  %v253_v22 = vld [vmem:[%s823_s6 + $0x68] sm:$0xff]  ;;  %v252_v23 = vld [vmem:[%s823_s6 + $0x60] sm:$0xff] }
  0x24   :  { %450 = vmatprep.subr.mxu1 %v592_v1  ;;  %481 = vmatprep.subr.mxu0 %v592_v1  ;;  %v251_v24 = vld [vmem:[%s823_s6 + $0x58] sm:$0xff]  ;;  %v250_v25 = vld [vmem:[%s823_s6 + $0x50] sm:$0xff]  ;;  %v249_v26 = vld [vmem:[%s823_s6 + $0x48] sm:$0xff] }
  0x25   :  { %451 = vmatpush3.msra.mxu1 %v158_v7  ;;  %482 = vmatpush3.msra.mxu0 %v254_v21  ;;  %v248_v27 = vld [vmem:[%s823_s6 + $0x40] sm:$0xff]  ;;  %v247_v28 = vld [vmem:[%s823_s6 + $0x38] sm:$0xff]  ;;  %v246_v29 = vld [vmem:[%s823_s6 + $0x30] sm:$0xff] }
  0x26   :  { %452 = vmatprep.subr.mxu1 %v592_v1  ;;  %483 = vmatprep.subr.mxu0 %v592_v1  ;;  %v245_v30 = vld [vmem:[%s823_s6 + $0x28] sm:$0xff]  ;;  %v244_v31 = vld [vmem:[%s823_s6 + $0x20] sm:$0xff]  ;;  %v243_v32 = vld [vmem:[%s823_s6 + $0x18] sm:$0xff] }
  0x27   :  { %453 = vmatpush3.msra.mxu1 %v157_v8  ;;  %484 = vmatpush3.msra.mxu0 %v253_v22  ;;  %v397_v33 = vld [vmem:[%s820_s3] ss:$0 sm:$0xff]  ;;  %v242_v38 = vld [vmem:[%s823_s6 + $0x10] sm:$0xff]  ;;  %v241_v39 = vld [vmem:[%s823_s6 + $0x8] sm:$0xff] }
  0x28   :  { %454 = vmatprep.subr.mxu1 %v592_v1  ;;  %485 = vmatprep.subr.mxu0 %v592_v1  ;;  %v240_v40 = vld [vmem:[%s823_s6] sm:$0xff] }
  0x29   :  { %455 = vmatpush3.msra.mxu1 %v156_v9  ;;  %486 = vmatpush3.msra.mxu0 %v252_v23  ;;  %v399_v41 = vld [vmem:[%s822_s5] ss:$0 sm:$0xff]  ;;  %v334_v51 = vld [vmem:[#allocation3] sm:$0xff] }
  0x2a   :  { %456 = vmatprep.subr.mxu1 %v592_v1  ;;  %487 = vmatprep.subr.mxu0 %v592_v1  ;;  %v400_v46 = vld [vmem:[%s824_s7] ss:$0 sm:$0xff]  ;;  %s595_s7 = smov [#allocation8]  }
  0x2b   :  { %457 = vmatpush3.msra.mxu1 %v155_v10  ;;  %488 = vmatpush3.msra.mxu0 %v251_v24  ;;  %v401_v55 = vld [vmem:[%s825_s8] ss:$0 sm:$0xff]  ;;  %s387_s8 = sshll.u32 %s595_s7, 4  ;;  %s388_s8 = int_to_ptr.vmem [resolvable:$true] %s387_s8 }
  0x2c   :  { %458 = vmatprep.subr.mxu1 %v592_v1  ;;  %489 = vmatprep.subr.mxu0 %v592_v1  ;;  %v402_v63 = vld [vmem:[#allocation2] ss:$0 sm:$0xff]  ;;  %s564_s9 = scalar_lea.vmem %s388_s8, 128  ;;  %p569_p11 = scmp.lt.s32.totalorder %s388_s8, %s388_s8 }
  0x2d   :  { %459 = vmatpush3.msra.mxu1 %v154_v11  ;;  %490 = vmatpush3.msra.mxu0 %v250_v25  ;;  %p565_p10 = scmp.ne.s32.totalorder %s388_s8, %s564_s9  ;;  %p570_p12 = scmp.lt.s32.totalorder %s564_s9, %s564_s9 }
  0x2e   :  { %460 = vmatprep.subr.mxu1 %v592_v1  ;;  %491 = vmatprep.subr.mxu0 %v592_v1 }
  0x2f   :  { %461 = vmatpush3.msra.mxu1 %v153_v12  ;;  %492 = vmatpush3.msra.mxu0 %v249_v26  ;;  %p571_p13 = por %p570_p12, %p569_p11 }
  0x30   :  { %462 = vmatprep.subr.mxu1 %v592_v1  ;;  %493 = vmatprep.subr.mxu0 %v592_v1 }
  0x31   :  { %463 = vmatpush3.msra.mxu1 %v152_v13  ;;  %494 = vmatpush3.msra.mxu0 %v248_v27  ;;  %p572_p0 = pnand %p571_p13, %p565_p10 }
  0x32   :  { %464 = vmatprep.subr.mxu1 %v592_v1  ;;  %495 = vmatprep.subr.mxu0 %v592_v1 }
  0x33   :  { %465 = vmatpush3.msra.mxu1 %v151_v14  ;;  %496 = vmatpush3.msra.mxu0 %v247_v28 }
  0x34   :  { %466 = vmatprep.subr.mxu1 %v592_v1  ;;  %497 = vmatprep.subr.mxu0 %v592_v1 }
  0x35   :  { %467 = vmatpush3.msra.mxu1 %v150_v15  ;;  %498 = vmatpush3.msra.mxu0 %v246_v29 }
  0x36   :  { %468 = vmatprep.subr.mxu1 %v592_v1  ;;  %499 = vmatprep.subr.mxu0 %v592_v1 }
  0x37   :  { %469 = vmatpush3.msra.mxu1 %v149_v16  ;;  %500 = vmatpush3.msra.mxu0 %v245_v30 }
  0x38   :  { %470 = vmatprep.subr.mxu1 %v592_v1  ;;  %501 = vmatprep.subr.mxu0 %v592_v1 }
  0x39   :  { %471 = vmatpush3.msra.mxu1 %v148_v17  ;;  %502 = vmatpush3.msra.mxu0 %v244_v31 }
  0x3a   :  { %472 = vmatprep.subr.mxu1 %v592_v1  ;;  %503 = vmatprep.subr.mxu0 %v592_v1 }
  0x3b   :  { %473 = vmatpush3.msra.mxu1 %v147_v18  ;;  %504 = vmatpush3.msra.mxu0 %v243_v32 }
  0x3c   :  { %474 = vmatprep.subr.mxu1 %v592_v1  ;;  %505 = vmatprep.subr.mxu0 %v592_v1 }
  0x3d   :  { %475 = vmatpush3.msra.mxu1 %v146_v19  ;;  %506 = vmatpush3.msra.mxu0 %v242_v38 }
  0x3e   :  { %507 = vmatprep.subr.mxu0 %v592_v1  ;;  %520 = vset.pattern.permute.xlu1 %v594_v61 }
  0x3f   :  { %508 = vmatpush3.msra.mxu0 %v241_v39  ;;  %521 = vset.pattern.permute.xlu0 %v594_v61 }
  0x40   :  { %509 = vmatprep.subr.mxu0 %v592_v1 }
  0x41   :  { %510 = vmatpush3.msra.mxu0 %v240_v40 }
  0xe0   :  { %v141_v34 = vpop.f32.mrf.mxu0 }
  0xe1   :  { %v142_v35 = vadd.f32 %v397_v33, %v141_v34 }
  0xe2   :  { %v443_v36 = vpop.f32.mrf.mxu0 }
  0xe3   :  { %v145_v37 = vmax.f32 %v142_v35, 0.0 }
  0xe5   :  { %477 = vmatmul.mubr.f32.vlgmr.msra.gmra.mxu1 %v145_v37 }
 0x1a5   :  { %v235_v42 = vpop.f32.mrf.mxu1 }
 0x1a6   :  { %v236_v43 = vadd.f32 %v399_v41, %v235_v42 }
 0x1a7   :  { %v478_v44 = vpop.f32.mrf.mxu1 }
 0x1a8   :  { %v239_v45 = vmax.f32 %v236_v43, 0.0 }
 0x1aa   :  { %512 = vmatmul.mubr.f32.vlgmr.msra.gmra.mxu0 %v239_v45 }
 0x26a   :  { %v329_v47 = vpop.f32.mrf.mxu0 }
 0x26b   :  { %v330_v48 = vadd.f32 %v400_v46, %v329_v47 }
 0x26c   :  { %v513_v49 = vpop.f32.mrf.mxu0 }
 0x26d   :  { %522 = vtanh.f32 %v330_v48  ;;  %v362_v59 = vsel %vm359_vm2, %v330_v48, 0.0 }
 0x26e   :  { %v363_v60 = vsel %vm71_vm1, %v362_v59, 0.0 }
 0x27a   :  { %v523_v52 = vpop.eup %522 }
 0x27b   :  { %v335_v53 = vsub.f32 %v334_v51, %v523_v52 }
 0x27d   :  { %v336_v56 = vmul.f32 %v335_v53, %v335_v53 }
 0x27f   :  { %v344_v57 = vmul.f32 %v401_v55, %v336_v56 }
 0x281   :  { %v345_v58 = vsel %vm71_vm1, %v344_v57, 0.0 }
 0x282   :  { %346 = vadd.xlane.f32.xlu0 %v345_v58 }
 0x286   :  { %364 = vadd.xlane.f32.xlu0 %v363_v60 }
 0x30b   :  { %v347_v62 = vpop.xlane.xlu0 %346 }
 0x30c   :  { %v349_v0 = vmul.f32 0.5, %v347_v62 }
 0x30e   :  { %v356_v1 = vsub.f32 %v402_v63, %v349_v0 }
 0x30f   :  { %v365_v2 = vpop.xlane.xlu0 %364 }
 0x310   :  { %371 = vperm.xlu1 %520, %v356_v1   ;;  %v378_v4 = vsel %vm375_vm3, %v365_v2, 0.0 }
 0x38b   :  { %v372_v3 = vpop.permute.xlu1 %371 }
 0x38c   :  { %v374_v5 = vsel %vm366_vm4, %v372_v3, 0.0 }
 0x38d   :  { %v379_v6 = vadd.f32 %v378_v4, %v374_v5 }
 0x38f   :  { %380 = vst.msk [vmem:[#allocation8] sm:$0xff] %vm71_vm1, %v379_v6 }
 0x390   :  { %575 = shalt.err (!%p572_p0)
}
 0x391   :  { %390 = dma.vmem_to_hbm [thread:$0]  %s388_s8, 128, %s827_s10, [#allocation5]  }
 0x392   :  { %588 = dma.done.wait [#allocation5], 128  }
 0x393   :  { %589 = vsyncadd [#allocation5], 4294967168 }
 0x394   :  { %394 = vsyncpa [#allocation4], 1 }
 0x395   :  { %395 = vsyncpa [#allocation7], 1 }
 0x396   :  { %396 = vsyncpa [#allocation5], 1 }

</bundles_post_ra>
